<compile_context>
chip_gen: v7x
topology: tpu7x:2x2x1
jax: 0.10.0
libtpu: 0.0.40
codegen_flags: <defaults>
</compile_context>

<pallas_src>
import functools
import math

import numpy as np

import jax
import jax.numpy as jnp
from jax.experimental import pallas as pl
from jax.experimental.pallas import tpu as pltpu


def _round_up(x, m):
    return ((x + m - 1) // m) * m


def _cdiv(a, b):
    return (a + b - 1) // b


def timestep_embedder_kernel(t_ref, freqs_ref, w1c_ref, w1s_ref, b1_ref, w2_ref, b2_ref, out_ref):
    # t_ref: (tn, 1) f32, freqs_ref: (1, half) f32,
    # w1c_ref/w1s_ref: (half, Hp) bf16, b1_ref: (1, Hp) f32,
    # w2_ref: (Hp, Hp) bf16, b2_ref: (1, Hp) f32, out_ref: (tn, Hp).
    t = t_ref[...]                      # (tn, 1)  f32
    freqs = freqs_ref[...]              # (1, half) f32
    args = t * freqs                    # (tn, half) f32 broadcast outer product

    # Sinusoid in f32 (EUP); downcast only the matmul operands.
    cos_e = jnp.cos(args).astype(w1c_ref.dtype)
    sin_e = jnp.sin(args).astype(w1s_ref.dtype)

    # First Linear, split over the cos/sin halves of W1 (no lane-dim concat).
    h = jnp.dot(cos_e, w1c_ref[...], preferred_element_type=jnp.float32)
    h = h + jnp.dot(sin_e, w1s_ref[...], preferred_element_type=jnp.float32)
    h = h + b1_ref[...]

    # SiLU in f32 on the VPU/EUP.
    h = h * jax.nn.sigmoid(h)

    # Second Linear: same operand dtype as the weights, f32 accumulation.
    out = jnp.dot(h.astype(w2_ref.dtype), w2_ref[...],
                  preferred_element_type=jnp.float32) + b2_ref[...]
    out_ref[...] = out.astype(out_ref.dtype)


def make_freqs(dim, max_period=10000):
    half = dim // 2
    return jnp.exp(
        -math.log(max_period) * jnp.arange(half, dtype=jnp.float32) / half
    )


def prepare_timestep_embedder_params(freqs, w1, b1, w2, b2, *, param_dtype=jnp.bfloat16):
    """One-time weight prep (call ONCE, not per step).

    * Splits W1 into its cos/sin halves (kills the lane-dim concat inside the kernel).
    * Casts matmul operands to `param_dtype` (bf16 by default; pass jnp.float32 for full parity).
    * Pads the hidden (output/lane) dim up to a multiple of 128 with zeros so the MXU N dim and
      the output stores are lane-dense.  Zero pad columns/rows are mathematically inert.

    Layout assumption: w1 rows are [cos_half | sin_half | optional zero-pad row] exactly as
    produced by TimestepEmbedder.timestep_embedding (odd `dim` zero-pads the last column, so
    any row past 2*half never contributes and is dropped here).
    """
    d, hidden = w1.shape
    half = int(freqs.shape[0])
    assert half == d // 2, "freqs length must equal frequency_embedding_size // 2"
    assert w2.shape == (hidden, hidden)

    hp = max(_round_up(hidden, 128), 128)  # lane-dense hidden

    def pad_cols(x):
        return jnp.pad(x, ((0, 0), (0, hp - hidden))) if hp != hidden else x

    w1c = pad_cols(w1[:half, :]).astype(param_dtype)
    w1s = pad_cols(w1[half:2 * half, :]).astype(param_dtype)
    w2p = jnp.pad(w2, ((0, hp - hidden), (0, hp - hidden))) if hp != hidden else w2
    w2p = w2p.astype(param_dtype)
    b1p = pad_cols(b1.reshape(1, hidden).astype(jnp.float32))
    b2p = pad_cols(b2.reshape(1, hidden).astype(jnp.float32))
    freqs2 = freqs.astype(jnp.float32).reshape(1, half)

    return {"freqs": freqs2, "w1c": w1c, "w1s": w1s, "b1": b1p, "w2": w2p, "b2": b2p}


@functools.partial(jax.jit, static_argnames=("hidden", "block_n", "out_dtype"))
def timestep_embedder(t, params, *, hidden, block_n=512, out_dtype=jnp.float32):
    """t: (N,) float timesteps; params from prepare_timestep_embedder_params.
    Returns (N, hidden) `out_dtype`, matching TimestepEmbedder.forward."""
    n = t.shape[0]
    half = params["freqs"].shape[1]
    hp = params["w1c"].shape[1]
    out_itemsize = np.dtype(out_dtype).itemsize

    # Balanced batch tiling: >= 2 grid steps whenever n > 8 (keeps both v7x TensorCores busy),
    # tiles as even as possible (multiple of 8 sublanes) to minimize dead padded rows.
    num_tiles = max(_cdiv(n, block_n), 2 if n > 8 else 1)
    tn = _round_up(_cdiv(n, num_tiles), 8)
    n_pad = _round_up(n, tn)
    grid = (n_pad // tn,)

    t2 = t.astype(jnp.float32).reshape(n, 1)
    if n_pad != n:
        t2 = jnp.pad(t2, ((0, n_pad - n), (0, 0)))

    # Constant-index blocks: single VMEM buffer (no pointless double-buffering of weights).
    resident = pl.Buffered(1)
    in_specs = [
        pl.BlockSpec((tn, 1), lambda i: (i, 0)),                                   # t tile (pipelined)
        pl.BlockSpec((1, half), lambda i: (0, 0), pipeline_mode=resident),         # freqs
        pl.BlockSpec((half, hp), lambda i: (0, 0), pipeline_mode=resident),        # W1 cos half
        pl.BlockSpec((half, hp), lambda i: (0, 0), pipeline_mode=resident),        # W1 sin half
        pl.BlockSpec((1, hp), lambda i: (0, 0), pipeline_mode=resident),           # b1
        pl.BlockSpec((hp, hp), lambda i: (0, 0), pipeline_mode=resident),          # W2
        pl.BlockSpec((1, hp), lambda i: (0, 0), pipeline_mode=resident),           # b2
    ]
    out_specs = pl.BlockSpec((tn, hp), lambda i: (i, 0))  # lane-dense output stores

    # Cost hint so XLA schedules the surrounding graph sensibly around this tiny custom call.
    param_bytes = sum(int(v.size) * v.dtype.itemsize for v in params.values())
    flops = 2 * n_pad * (2 * half) * hp + 2 * n_pad * hp * hp
    transcendentals = n_pad * (2 * half + hp)  # cos + sin + sigmoid
    bytes_accessed = param_bytes + n_pad * 4 + n_pad * hp * out_itemsize
    cost = pl.CostEstimate(flops=flops, transcendentals=transcendentals,
                           bytes_accessed=bytes_accessed)

    # VMEM budget: single-buffered weights + double-buffered t/out tiles + f32 intermediates.
    # Only raise the scoped limit when the default (16 MiB on v5e) would be tight; cap at the
    # v7x physical 64 MiB so the same config stays portable.
    io_vmem = 2 * (tn * 4 + tn * hp * out_itemsize)
    scratch_vmem = tn * half * 4 * 2 + tn * hp * 4 * 3
    vmem_needed = int(1.25 * (param_bytes + io_vmem + scratch_vmem)) + (1 << 20)
    vmem_limit = None if vmem_needed <= (16 << 20) else min(vmem_needed, 64 << 20)

    out = pl.pallas_call(
        timestep_embedder_kernel,
        out_shape=jax.ShapeDtypeStruct((n_pad, hp), out_dtype),
        grid_spec=pltpu.PrefetchScalarGridSpec(
            num_scalar_prefetch=0,
            grid=grid,
            in_specs=in_specs,
            out_specs=out_specs,
        ),
        compiler_params=pltpu.CompilerParams(
            dimension_semantics=(pltpu.PARALLEL,),  # batch axis shards across cores on v7x
            vmem_limit_bytes=vmem_limit,
        ),
        cost_estimate=cost,
    )(t2, params["freqs"], params["w1c"], params["w1s"], params["b1"],
      params["w2"], params["b2"])

    # Drop padded batch rows and padded hidden lanes (fuses into the jitted wrapper).
    return out[:n, :hidden]


def _reference(t, freqs, w1, b1, w2, b2, *, mirror_bf16):
    """Pure-JAX reference. mirror_bf16=True mimics the kernel's operand precision."""
    half = freqs.shape[0]
    args = t[:, None].astype(jnp.float32) * freqs[None, :]
    cos_e, sin_e = jnp.cos(args), jnp.sin(args)
    if mirror_bf16:
        cos_e = cos_e.astype(jnp.bfloat16)
        sin_e = sin_e.astype(jnp.bfloat16)
        w1c = w1[:half].astype(jnp.bfloat16)
        w1s = w1[half:2 * half].astype(jnp.bfloat16)
        w2c = w2.astype(jnp.bfloat16)
    else:
        w1c, w1s, w2c = w1[:half], w1[half:2 * half], w2
    h = (jnp.dot(cos_e, w1c, preferred_element_type=jnp.float32)
         + jnp.dot(sin_e, w1s, preferred_element_type=jnp.float32) + b1)
    h = h * jax.nn.sigmoid(h)
    if mirror_bf16:
        h = h.astype(jnp.bfloat16)
    return jnp.dot(h, w2c, preferred_element_type=jnp.float32) + b2


if __name__ == "__main__":
    # Small shapes consistent with the module: batch N=8, freq_emb=512, hidden=32.
    N = 8
    FREQ_EMB = 512
    HIDDEN = 32

    key = jax.random.PRNGKey(0)
    k_t, k_w1, k_b1, k_w2, k_b2, k_t2 = jax.random.split(key, 6)

    t = jax.random.uniform(k_t, (N,), dtype=jnp.float32)  # fractional timesteps

    # nn.Linear weights stored transposed as (in_features, out_features).
    w1 = jax.random.normal(k_w1, (FREQ_EMB, HIDDEN), dtype=jnp.float32) / math.sqrt(FREQ_EMB)
    b1 = jax.random.normal(k_b1, (HIDDEN,), dtype=jnp.float32) * 0.01
    w2 = jax.random.normal(k_w2, (HIDDEN, HIDDEN), dtype=jnp.float32) / math.sqrt(HIDDEN)
    b2 = jax.random.normal(k_b2, (HIDDEN,), dtype=jnp.float32) * 0.01

    freqs = make_freqs(FREQ_EMB)

    # One-time prep (split + bf16 cast + lane padding) -- NOT in the per-step hot path.
    params = prepare_timestep_embedder_params(freqs, w1, b1, w2, b2)
    params = jax.tree_util.tree_map(jax.block_until_ready, params)

    # --- Small-batch path (single tile, tn = 8, grid=(1,)) ---
    out = jax.block_until_ready(timestep_embedder(t, params, hidden=HIDDEN))
    assert out.shape == (N, HIDDEN)

    ref_bf16 = _reference(t, freqs, w1, b1, w2, b2, mirror_bf16=True)
    ref_f32 = _reference(t, freqs, w1, b1, w2, b2, mirror_bf16=False)
    assert jnp.allclose(out, ref_bf16, atol=2e-3, rtol=2e-3), "mismatch vs bf16-mirrored reference"
    assert jnp.allclose(out, ref_f32, atol=5e-2, rtol=5e-2), "mismatch vs f32 reference"

    # --- Gridded path (balanced tiling + padding: N=300 -> tn=152, grid=(2,), 4 dead rows) ---
    N2 = 300
    t_big = jax.random.uniform(k_t2, (N2,), dtype=jnp.float32)
    out_big = jax.block_until_ready(timestep_embedder(t_big, params, hidden=HIDDEN))
    assert out_big.shape == (N2, HIDDEN)
    ref_big = _reference(t_big, freqs, w1, b1, w2, b2, mirror_bf16=True)
    assert jnp.allclose(out_big, ref_big, atol=2e-3, rtol=2e-3), "gridded path mismatch"

    print("KERNEL_OK")
</pallas_src>

<mosaic_0001>
module attributes {stable_mosaic.version = 11 : i64} {
  func.func @timestep_embedder_kernel(%arg0: i32, %arg1: memref<8x1xf32, #tpu.memory_space<vmem>>, %arg2: memref<1x256xf32, #tpu.memory_space<vmem>>, %arg3: memref<256x128xbf16, #tpu.memory_space<vmem>>, %arg4: memref<256x128xbf16, #tpu.memory_space<vmem>>, %arg5: memref<1x128xf32, #tpu.memory_space<vmem>>, %arg6: memref<128x128xbf16, #tpu.memory_space<vmem>>, %arg7: memref<1x128xf32, #tpu.memory_space<vmem>>, %arg8: memref<8x128xf32, #tpu.memory_space<vmem>>) attributes {dimension_semantics = [#tpu.dimension_semantics<parallel>], iteration_bounds = array<i64: 1>, scalar_prefetch = 0 : i64, scratch_operands = 0 : i64, tpu.core_type = #tpu.core_type<tc>, window_params = [{transform_indices = @transform_0, window_bounds = array<i64: 8, 1>}, {pipeline_mode = #tpu.pipeline_mode<synchronous>, transform_indices = @transform_1, window_bounds = array<i64: 1, 256>}, {pipeline_mode = #tpu.pipeline_mode<synchronous>, transform_indices = @transform_2, window_bounds = array<i64: 256, 128>}, {pipeline_mode = #tpu.pipeline_mode<synchronous>, transform_indices = @transform_3, window_bounds = array<i64: 256, 128>}, {pipeline_mode = #tpu.pipeline_mode<synchronous>, transform_indices = @transform_4, window_bounds = array<i64: 1, 128>}, {pipeline_mode = #tpu.pipeline_mode<synchronous>, transform_indices = @transform_5, window_bounds = array<i64: 128, 128>}, {pipeline_mode = #tpu.pipeline_mode<synchronous>, transform_indices = @transform_6, window_bounds = array<i64: 1, 128>}, {transform_indices = @transform_7, window_bounds = array<i64: 8, 128>}]} {
    %c0 = arith.constant 0 : index
    %c0_0 = arith.constant 0 : index
    %0 = vector.load %arg1[%c0, %c0_0] : memref<8x1xf32, #tpu.memory_space<vmem>>, vector<8x1xf32>
    %c0_1 = arith.constant 0 : index
    %c0_2 = arith.constant 0 : index
    %1 = vector.load %arg2[%c0_1, %c0_2] : memref<1x256xf32, #tpu.memory_space<vmem>>, vector<1x256xf32>
    %2 = vector.broadcast %0 : vector<8x1xf32> to vector<8x256xf32>
    %3 = vector.broadcast %1 : vector<1x256xf32> to vector<8x256xf32>
    %4 = arith.mulf %2, %3 : vector<8x256xf32>
    %5 = math.cos %4 : vector<8x256xf32>
    %6 = arith.truncf %5 : vector<8x256xf32> to vector<8x256xbf16>
    %7 = math.sin %4 : vector<8x256xf32>
    %8 = arith.truncf %7 : vector<8x256xf32> to vector<8x256xbf16>
    %c0_3 = arith.constant 0 : index
    %c0_4 = arith.constant 0 : index
    %9 = vector.load %arg3[%c0_3, %c0_4] : memref<256x128xbf16, #tpu.memory_space<vmem>>, vector<256x128xbf16>
    %cst = arith.constant dense<0.000000e+00> : vector<8x128xf32>
    %10 = tpu.matmul %6, %9, %cst {dimension_numbers = #tpu.dot_dimension_numbers<[1], [0], [0], [1], [0, 0, 1, 1], [], []>} : vector<8x256xbf16>, vector<256x128xbf16>, vector<8x128xf32> -> vector<8x128xf32>
    %c0_5 = arith.constant 0 : index
    %c0_6 = arith.constant 0 : index
    %11 = vector.load %arg4[%c0_5, %c0_6] : memref<256x128xbf16, #tpu.memory_space<vmem>>, vector<256x128xbf16>
    %cst_7 = arith.constant dense<0.000000e+00> : vector<8x128xf32>
    %12 = tpu.matmul %8, %11, %cst_7 {dimension_numbers = #tpu.dot_dimension_numbers<[1], [0], [0], [1], [0, 0, 1, 1], [], []>} : vector<8x256xbf16>, vector<256x128xbf16>, vector<8x128xf32> -> vector<8x128xf32>
    %13 = arith.addf %10, %12 : vector<8x128xf32>
    %c0_8 = arith.constant 0 : index
    %c0_9 = arith.constant 0 : index
    %14 = vector.load %arg5[%c0_8, %c0_9] : memref<1x128xf32, #tpu.memory_space<vmem>>, vector<1x128xf32>
    %15 = vector.broadcast %14 : vector<1x128xf32> to vector<8x128xf32>
    %16 = arith.addf %13, %15 : vector<8x128xf32>
    %17 = arith.negf %16 : vector<8x128xf32>
    %18 = math.exp %17 : vector<8x128xf32>
    %cst_10 = arith.constant 1.000000e+00 : f32
    %19 = vector.broadcast %cst_10 : f32 to vector<8x128xf32>
    %20 = arith.addf %19, %18 : vector<8x128xf32>
    %21 = arith.divf %19, %20 : vector<8x128xf32>
    %22 = arith.mulf %16, %21 : vector<8x128xf32>
    %23 = arith.truncf %22 : vector<8x128xf32> to vector<8x128xbf16>
    %c0_11 = arith.constant 0 : index
    %c0_12 = arith.constant 0 : index
    %24 = vector.load %arg6[%c0_11, %c0_12] : memref<128x128xbf16, #tpu.memory_space<vmem>>, vector<128x128xbf16>
    %cst_13 = arith.constant dense<0.000000e+00> : vector<8x128xf32>
    %25 = tpu.matmul %23, %24, %cst_13 {dimension_numbers = #tpu.dot_dimension_numbers<[1], [0], [0], [1], [0, 0, 1, 1], [], []>} : vector<8x128xbf16>, vector<128x128xbf16>, vector<8x128xf32> -> vector<8x128xf32>
    %c0_14 = arith.constant 0 : index
    %c0_15 = arith.constant 0 : index
    %26 = vector.load %arg7[%c0_14, %c0_15] : memref<1x128xf32, #tpu.memory_space<vmem>>, vector<1x128xf32>
    %27 = vector.broadcast %26 : vector<1x128xf32> to vector<8x128xf32>
    %28 = arith.addf %25, %27 : vector<8x128xf32>
    %c0_16 = arith.constant 0 : index
    %c0_17 = arith.constant 0 : index
    %29 = vector.load %arg8[%c0_16, %c0_17] : memref<8x128xf32, #tpu.memory_space<vmem>>, vector<8x128xf32>
    tpu.vector_store %arg8[%c0_16, %c0_17], %28 {strides = array<i32>} : memref<8x128xf32, #tpu.memory_space<vmem>>, vector<8x128xf32>,
    return
  }
  func.func @transform_0(%arg0: i32) -> (i32, i32) {
    %c0_i32 = arith.constant 0 : i32
    %c0_i32_0 = arith.constant 0 : i32
    return %arg0, %c0_i32 : i32, i32
  }
  func.func @transform_1(%arg0: i32) -> (i32, i32) {
    %c0_i32 = arith.constant 0 : i32
    %c0_i32_0 = arith.constant 0 : i32
    %c0_i32_1 = arith.constant 0 : i32
    return %c0_i32, %c0_i32_0 : i32, i32
  }
  func.func @transform_2(%arg0: i32) -> (i32, i32) {
    %c0_i32 = arith.constant 0 : i32
    %c0_i32_0 = arith.constant 0 : i32
    %c0_i32_1 = arith.constant 0 : i32
    return %c0_i32, %c0_i32_0 : i32, i32
  }
  func.func @transform_3(%arg0: i32) -> (i32, i32) {
    %c0_i32 = arith.constant 0 : i32
    %c0_i32_0 = arith.constant 0 : i32
    %c0_i32_1 = arith.constant 0 : i32
    return %c0_i32, %c0_i32_0 : i32, i32
  }
  func.func @transform_4(%arg0: i32) -> (i32, i32) {
    %c0_i32 = arith.constant 0 : i32
    %c0_i32_0 = arith.constant 0 : i32
    %c0_i32_1 = arith.constant 0 : i32
    return %c0_i32, %c0_i32_0 : i32, i32
  }
  func.func @transform_5(%arg0: i32) -> (i32, i32) {
    %c0_i32 = arith.constant 0 : i32
    %c0_i32_0 = arith.constant 0 : i32
    %c0_i32_1 = arith.constant 0 : i32
    return %c0_i32, %c0_i32_0 : i32, i32
  }
  func.func @transform_6(%arg0: i32) -> (i32, i32) {
    %c0_i32 = arith.constant 0 : i32
    %c0_i32_0 = arith.constant 0 : i32
    %c0_i32_1 = arith.constant 0 : i32
    return %c0_i32, %c0_i32_0 : i32, i32
  }
  func.func @transform_7(%arg0: i32) -> (i32, i32) {
    %c0_i32 = arith.constant 0 : i32
    %c0_i32_0 = arith.constant 0 : i32
    return %arg0, %c0_i32 : i32, i32
  }
}

</mosaic_0001>

<bundles_post_ra>
// kernel: timestep_embedder.1
= control target key start
LH: loop header
LB: loop body
LE: loop exit
PB: predicated region body
PF: predicated region fallthrough
CT: control target
= control target key end

     0   :  { %12 = vsyncpa [#allocation3], 0  ;;  %s1501_s0 = inlined_call_operand.vmem [shape: f32[8,1], index: 0, kind: input, shape index: {}]   ;;  %s1502_s1 = inlined_call_operand.vmem [shape: f32[1,256], index: 1, kind: input, shape index: {}]   ;;  %s1503_s2 = inlined_call_operand.hbm [shape: bf16[256,128], index: 2, kind: input, shape index: {}]   ;;  %s1504_s3 = inlined_call_operand.hbm [shape: bf16[256,128], index: 3, kind: input, shape index: {}]   ;;  %s1505_s4 = inlined_call_operand.vmem [shape: f32[1,128], index: 4, kind: input, shape index: {}]   ;;  %s1506_s5 = inlined_call_operand.hbm [shape: bf16[128,128], index: 5, kind: input, shape index: {}]   ;;  %s1507_s6 = inlined_call_operand.vmem [shape: f32[1,128], index: 6, kind: input, shape index: {}]   ;;  %s1508_s7 = inlined_call_operand.hbm [shape: f32[8,128], index: 7, kind: output, shape index: {}]  }
   0x1   :  { %13 = vsyncpa [#allocation6], 0 }
   0x2   :  { %14 = vsyncpa [#allocation4], 0  ;;  %s1289_s24 = smov [#allocation5]   ;;  %s1290_s26 = smov [#allocation2]  }
   0x3   :  { %s36_s25 = sshll.u32 %s1289_s24, 4  ;;  %s24_s27 = sshll.u32 %s1290_s26, 4  ;;  %s37_s25 = int_to_ptr.vmem [resolvable:$true] %s36_s25  ;;  %s1344_s27 = int_to_ptr.vmem [resolvable:$true] %s24_s27 }
   0x4   :  { %s1195_s30 = scalar_lea.hbm %s1504_s3, 2048 }
   0x5   :  { %p1196_p0 = scmp.ne.s32.totalorder %s1504_s3, %s1195_s30  ;;  %p1199_p1 = scmp.lt.u32.totalorder %s1195_s30, %s1504_s3 }
   0x7   :  { %p1201_p2 = pnand %p1199_p1, %p1196_p0 }
   0x9   :  { %1204 = shalt.err (!%p1201_p2)
}
   0xa   :  { %s1205_s12 = scalar_lea.vmem %s37_s25, 2048  ;;  %p1210_p4 = scmp.lt.s32.totalorder %s37_s25, %s37_s25 }
   0xb   :  { %p1206_p3 = scmp.ne.s32.totalorder %s37_s25, %s1205_s12  ;;  %p1211_p5 = scmp.lt.s32.totalorder %s1205_s12, %s1205_s12 }
   0xd   :  { %p1212_p6 = por %p1211_p5, %p1210_p4 }
   0xf   :  { %p1213_p7 = pnand %p1212_p6, %p1206_p3 }
  0x11   :  { %1216 = shalt.err (!%p1213_p7)
}
  0x12   :  { %s1291_s13 = smov 64   ;;  %s1292_s14 = smov 4  }
  0x13   :  { %42 = dma.hbm_to_vmem [thread:$0]  %s1504_s3, 2048, %s37_s25, [#allocation6], %s1291_s13, %s1291_s13, %s1292_s14  }
  0x14   :  { %s1217_s19 = scalar_lea.hbm %s1503_s2, 2048 }
  0x15   :  { %p1218_p8 = scmp.ne.s32.totalorder %s1503_s2, %s1217_s19  ;;  %p1221_p9 = scmp.lt.u32.totalorder %s1217_s19, %s1503_s2 }
  0x17   :  { %p1223_p10 = pnand %p1221_p9, %p1218_p8 }
  0x19   :  { %1226 = shalt.err (!%p1223_p10)
}
  0x1a   :  { %s1227_s24 = scalar_lea.vmem %s1344_s27, 2048  ;;  %p1232_p12 = scmp.lt.s32.totalorder %s1344_s27, %s1344_s27 }
  0x1b   :  { %p1228_p11 = scmp.ne.s32.totalorder %s1344_s27, %s1227_s24  ;;  %p1233_p13 = scmp.lt.s32.totalorder %s1227_s24, %s1227_s24 }
  0x1d   :  { %p1234_p0 = por %p1233_p13, %p1232_p12 }
  0x1f   :  { %p1235_p1 = pnand %p1234_p0, %p1228_p11 }
  0x21   :  { %1238 = shalt.err (!%p1235_p1)
}
  0x22   :  { %30 = dma.hbm_to_vmem [thread:$0]  %s1503_s2, 2048, %s1344_s27, [#allocation3], %s1291_s13, %s1291_s13, %s1292_s14  }
  0x23   :  { %s1293_s26 = smov [#allocation7]   ;;  %s1239_s8 = scalar_lea.hbm %s1506_s5, 1024 }
  0x24   :  { %s50_s28 = sshll.u32 %s1293_s26, 4  ;;  %p1240_p2 = scmp.ne.s32.totalorder %s1506_s5, %s1239_s8  ;;  %s51_s28 = int_to_ptr.vmem [resolvable:$true] %s50_s28 }
  0x25   :  { %p1243_p3 = scmp.lt.u32.totalorder %s1239_s8, %s1506_s5 }
  0x27   :  { %p1245_p4 = pnand %p1243_p3, %p1240_p2 }
  0x29   :  { %1248 = shalt.err (!%p1245_p4)
}
  0x2a   :  { %s1249_s15 = scalar_lea.vmem %s51_s28, 1024  ;;  %p1254_p6 = scmp.lt.s32.totalorder %s51_s28, %s51_s28 }
  0x2b   :  { %p1250_p5 = scmp.ne.s32.totalorder %s51_s28, %s1249_s15  ;;  %p1255_p7 = scmp.lt.s32.totalorder %s1249_s15, %s1249_s15 }
  0x2d   :  { %p1256_p8 = por %p1255_p7, %p1254_p6 }
  0x2f   :  { %p1257_p9 = pnand %p1256_p8, %p1250_p5 }
  0x31   :  { %1260 = shalt.err (!%p1257_p9)
}
  0x32   :  { %56 = dma.hbm_to_vmem [thread:$0]  %s1506_s5, 1024, %s51_s28, [#allocation6], %s1291_s13, %s1291_s13, %s1292_s14  }
  0x33   :  { %1283 = dma.done.wait [#allocation3], 2048  }
  0x34   :  { %1284 = vsyncadd [#allocation3], 4294965248 }
  0x35   :  { %1285 = dma.done.wait [#allocation6], 3072  }
  0x36   :  { %1286 = vsyncadd [#allocation6], 4294964224  ;;  %v1294_v0 = vmov 0   ;;  %v69_v1 = vld [vmem:[%s1501_s0] sm:$0xff]  ;;  %v1147_v6 = vld [vmem:[#allocation5 + $0x48] sm:$0xff]   ;;  %v77_v34 = vlaneseq  ;;  %s1303_s19 = smov [#allocation8]  }
  0x37   :  { %1142 = vset.pattern.permute.xlu0 %v1294_v0  ;;  %v1143_v2 = vld [vmem:[#allocation5 + $0x40] sm:$0xff]   ;;  %v1148_v7 = vld [vmem:[#allocation2 + $0x48] sm:$0xff]   ;;  %v1151_v10 = vld [vmem:[#allocation5 + $0x50] sm:$0xff]   ;;  %v1295_v0 = vmov 683565275   ;;  %s977_s20 = sshll.u32 %s1303_s19, 4  ;;  %s978_s20 = int_to_ptr.vmem [resolvable:$true] %s977_s20 }
  0x38   :  { %73 = vperm.xlu0 %1142, %v69_v1   ;;  %v1144_v3 = vld [vmem:[#allocation2 + $0x40] sm:$0xff]   ;;  %1046 = vmatprep.subr.bf16.mxu0 %v1143_v2  ;;  %v1149_v8 = vld [vmem:[#allocation5 + $0x8] sm:$0xff]   ;;  %v1152_v11 = vld [vmem:[#allocation2 + $0x50] sm:$0xff]   ;;  %v78_v35 = vshrl.u32 %v77_v34, 7  ;;  %v1296_v2 = vmov 2475754826   ;;  %p1266_p11 = scmp.lt.s32.totalorder %s978_s20, %s978_s20 }
  0x39   :  { %v1145_v4 = vld [vmem:[#allocation5] sm:$0xff]   ;;  %1068 = vmatprep.subr.bf16.mxu1 %v1144_v3  ;;  %v1150_v9 = vld [vmem:[#allocation2 + $0x8] sm:$0xff]   ;;  %v1153_v12 = vld [vmem:[#allocation5 + $0x10] sm:$0xff]  }
  0x3a   :  { %v1146_v5 = vld [vmem:[#allocation2] sm:$0xff]   ;;  %1047 = vmatpush3.bf16.msra.mxu0 %v1145_v4  ;;  %v1154_v13 = vld [vmem:[#allocation2 + $0x10] sm:$0xff]   ;;  %v1155_v14 = vld [vmem:[#allocation5 + $0x58] sm:$0xff]   ;;  %v79_v36 = vsub.s32 0, %v78_v35  ;;  %v83_v37 = vsub.s32 1, %v78_v35 }
  0x3b   :  { %1069 = vmatpush3.bf16.msra.mxu1 %v1146_v5  ;;  %1048 = vmatprep.subr.bf16.mxu0 %v1147_v6  ;;  %v1156_v15 = vld [vmem:[#allocation2 + $0x58] sm:$0xff]   ;;  %v1159_v18 = vld [vmem:[#allocation5 + $0x60] sm:$0xff]   ;;  %v1163_v22 = vld [vmem:[#allocation5 + $0x68] sm:$0xff]   ;;  %v1297_v5 = vmov 2131351028  }
  0x3c   :  { %1070 = vmatprep.subr.bf16.mxu1 %v1148_v7  ;;  %v1157_v16 = vld [vmem:[#allocation5 + $0x18] sm:$0xff]   ;;  %v1160_v19 = vld [vmem:[#allocation2 + $0x60] sm:$0xff]   ;;  %v1164_v23 = vld [vmem:[#allocation2 + $0x68] sm:$0xff]   ;;  %v1298_v7 = vmov 2102212464  }
  0x3d   :  { %v1158_v17 = vld [vmem:[#allocation2 + $0x18] sm:$0xff]   ;;  %v1161_v20 = vld [vmem:[#allocation5 + $0x20] sm:$0xff]   ;;  %v1165_v24 = vld [vmem:[#allocation5 + $0x28] sm:$0xff]  }
  0x3e   :  { %1049 = vmatpush3.bf16.msra.mxu0 %v1149_v8  ;;  %v1162_v21 = vld [vmem:[#allocation2 + $0x20] sm:$0xff]   ;;  %v1166_v25 = vld [vmem:[#allocation2 + $0x28] sm:$0xff]   ;;  %v1167_v26 = vld [vmem:[#allocation5 + $0x70] sm:$0xff]  }
  0x3f   :  { %1071 = vmatpush3.bf16.msra.mxu1 %v1150_v9  ;;  %1050 = vmatprep.subr.bf16.mxu0 %v1151_v10  ;;  %v1168_v27 = vld [vmem:[#allocation2 + $0x70] sm:$0xff]   ;;  %v1171_v30 = vld [vmem:[#allocation5 + $0x78] sm:$0xff]   ;;  %v70_v38 = vld [vmem:[%s1502_s1] sm:$0x3]  ;;  %v1299_v9 = vmov 920167782  }
  0x40   :  { %1072 = vmatprep.subr.bf16.mxu1 %v1152_v11  ;;  %v1169_v28 = vld [vmem:[#allocation5 + $0x30] sm:$0xff]   ;;  %v1172_v31 = vld [vmem:[#allocation2 + $0x78] sm:$0xff]   ;;  %v80_v39 = vrot.slane %v70_v38, %v79_v36  ;;  %v84_v40 = vrot.slane %v70_v38, %v83_v37 }
  0x41   :  { %v1170_v29 = vld [vmem:[#allocation2 + $0x30] sm:$0xff]   ;;  %v1173_v32 = vld [vmem:[#allocation5 + $0x38] sm:$0xff]  }
  0x42   :  { %1051 = vmatpush3.bf16.msra.mxu0 %v1153_v12  ;;  %v1174_v33 = vld [vmem:[#allocation2 + $0x38] sm:$0xff]  }
  0x43   :  { %1073 = vmatpush3.bf16.msra.mxu1 %v1154_v13  ;;  %1052 = vmatprep.subr.bf16.mxu0 %v1155_v14 }
  0x44   :  { %1074 = vmatprep.subr.bf16.mxu1 %v1156_v15 }
  0x46   :  { %1053 = vmatpush3.bf16.msra.mxu0 %v1157_v16  ;;  %v1300_v16 = vmov 1326507024  }
  0x47   :  { %1075 = vmatpush3.bf16.msra.mxu1 %v1158_v17  ;;  %1054 = vmatprep.subr.bf16.mxu0 %v1159_v18 }
  0x48   :  { %1076 = vmatprep.subr.bf16.mxu1 %v1160_v19 }
  0x4a   :  { %1055 = vmatpush3.bf16.msra.mxu0 %v1161_v20 }
  0x4b   :  { %1077 = vmatpush3.bf16.msra.mxu1 %v1162_v21  ;;  %1056 = vmatprep.subr.bf16.mxu0 %v1163_v22 }
  0x4c   :  { %1078 = vmatprep.subr.bf16.mxu1 %v1164_v23 }
  0x4e   :  { %1057 = vmatpush3.bf16.msra.mxu0 %v1165_v24 }
  0x4f   :  { %1079 = vmatpush3.bf16.msra.mxu1 %v1166_v25  ;;  %1058 = vmatprep.subr.bf16.mxu0 %v1167_v26 }
  0x50   :  { %1080 = vmatprep.subr.bf16.mxu1 %v1168_v27 }
  0x52   :  { %1059 = vmatpush3.bf16.msra.mxu0 %v1169_v28 }
  0x53   :  { %1081 = vmatpush3.bf16.msra.mxu1 %v1170_v29  ;;  %1060 = vmatprep.subr.bf16.mxu0 %v1171_v30 }
  0x54   :  { %1082 = vmatprep.subr.bf16.mxu1 %v1172_v31 }
  0x56   :  { %1061 = vmatpush3.bf16.msra.mxu0 %v1173_v32 }
  0x57   :  { %1083 = vmatpush3.bf16.msra.mxu1 %v1174_v33 }
  0xb7   :  { %v74_v41 = vpop.permute.xlu0 %73 }
  0xb8   :  { %v1402_v42 = vmul.f32 %v80_v39, %v74_v41  ;;  %v1404_v43 = vmul.f32 %v84_v40, %v74_v41 }
  0xba   :  { %v89_v44 = vand.u32 2147483647, %v1402_v42  ;;  %v92_v45 = vand.u32 2139095040, %v1402_v42  ;;  %v195_v46 = vand.u32 2139095040, %v1404_v43  ;;  %v192_v55 = vand.u32 2147483647, %v1404_v43 }
  0xbb   :  { %vm91_vm15 = vcmp.lt.s32.totalorder %v1402_v42, 0 }
  0xbc   :  { %v93_v47 = vshrl.u32 %v92_v45, 23  ;;  %v196_v48 = vshrl.u32 %v195_v46, 23  ;;  %v96_v49 = vand.u32 8388607, %v89_v44  ;;  %v1418_v62 = vand.u32 8388607, %v192_v55 }
  0xbd   :  { %vm90_vm14 = vcmp.le.f32.partialorder %v89_v44, 0.7853982 }
  0xbe   :  { %v987_v50 = vadd.s32 4294967169, %v93_v47  ;;  %v991_v51 = vadd.s32 4294967169, %v196_v48  ;;  %v97_v54 = vor.u32 8388608, %v96_v49 }
  0xc0   :  { %v99_v52 = vadd.s32 1, %v987_v50  ;;  %v202_v53 = vadd.s32 1, %v991_v51  ;;  %v1412_v60 = vshll.u32 %v97_v54, 8  ;;  %v200_v50 = vor.u32 8388608, %v1418_v62 }
  0xc2   :  { %vm100_vm0 = vcmp.gt.s32.totalorder %v99_v52, 0  ;;  %vm203_vm1 = vcmp.gt.s32.totalorder %v202_v53, 0 }
  0xc3   :  { %v101_v56 = vsel %vm100_vm0, %v99_v52, 0  ;;  %v204_v57 = vsel %vm203_vm1, %v202_v53, 0  ;;  %vm194_vm0 = vcmp.lt.s32.totalorder %v1404_v43, 0  ;;  %vm193_vm1 = vcmp.le.f32.partialorder %v192_v55, 0.7853982 }
  0xc4   :  { %v102_v58 = vshrl.u32 %v101_v56, 5  ;;  %v103_v59 = vand.u32 31, %v101_v56  ;;  %v1414_v61 = vshrl.u32 %v204_v57, 5  ;;  %v206_v4 = vand.u32 31, %v204_v57 }
  0xc6   :  { %v104_v63 = vsub.s32 32, %v103_v59  ;;  %v106_v1 = vshll.u32 %v1295_v0, %v103_v59  ;;  %v109_v3 = vshll.u32 %v1296_v2, %v103_v59  ;;  %v112_v6 = vshll.u32 %v1297_v5, %v103_v59 }
  0xc7   :  { %v115_v8 = vshll.u32 %v1298_v7, %v103_v59  ;;  %v118_v10 = vshll.u32 %v1299_v9, %v103_v59  ;;  %vm121_vm2 = vcmp.lt.s32.totalorder %v102_v58, 1  ;;  %vm122_vm3 = vcmp.lt.s32.totalorder %v102_v58, 2 }
  0xc8   :  { %v107_v11 = vshrl.u32 %v1296_v2, %v104_v63  ;;  %v110_v12 = vshrl.u32 %v1297_v5, %v104_v63  ;;  %v113_v13 = vshrl.u32 %v1298_v7, %v104_v63  ;;  %v105_v14 = vshrl.u32 %v1295_v0, %v104_v63 }
  0xc9   :  { %v116_v15 = vshrl.u32 %v1299_v9, %v104_v63  ;;  %v119_v17 = vshrl.u32 %v1300_v16, %v104_v63  ;;  %vm123_vm4 = vcmp.lt.s32.totalorder %v102_v58, 3  ;;  %v207_v21 = vsub.s32 32, %v206_v4 }
  0xca   :  { %v108_v18 = vor.u32 %v107_v11, %v106_v1  ;;  %v111_v19 = vor.u32 %v110_v12, %v109_v3  ;;  %v114_v20 = vor.u32 %v113_v13, %v112_v6  ;;  %vm124_vm5 = vcmp.lt.s32.totalorder %v102_v58, 4 }
  0xcb   :  { %v117_v22 = vor.u32 %v116_v15, %v115_v8  ;;  %v120_v23 = vor.u32 %v119_v17, %v118_v10  ;;  %v218_v24 = vshll.u32 %v1298_v7, %v206_v4  ;;  %v219_v32 = vshrl.u32 %v1299_v9, %v207_v21 }
  0xcc   :  { %v125_v25 = vsel %vm121_vm2, %v105_v14, %v108_v18  ;;  %v126_v26 = vsel %vm124_vm5, %v114_v20, 2102212464  ;;  %v129_v27 = vsel %vm121_vm2, %v108_v18, %v111_v19  ;;  %v133_v28 = vsel %vm121_vm2, %v111_v19, %v114_v20 }
  0xcd   :  { %v127_v29 = vsel %vm123_vm4, %v111_v19, %v126_v26  ;;  %v130_v30 = vsel %vm124_vm5, %v117_v22, 920167782  ;;  %v134_v31 = vsel %vm124_vm5, %v120_v23, 1326507024  ;;  %v222_v36 = vshrl.u32 %v1300_v16, %v207_v21 }
  0xce   :  { %v128_v33 = vsel %vm122_vm3, %v125_v25, %v127_v29  ;;  %v131_v34 = vsel %vm123_vm4, %v114_v20, %v130_v30  ;;  %v135_v35 = vsel %vm123_vm4, %v117_v22, %v134_v31  ;;  %v220_v39 = vor.u32 %v219_v32, %v218_v24 }
  0xcf   :  { %v132_v37 = vsel %vm122_vm3, %v129_v27, %v131_v34  ;;  %v136_v38 = vsel %vm122_vm3, %v133_v28, %v135_v35  ;;  %v221_v40 = vshll.u32 %v1299_v9, %v206_v4  ;;  %v144_v48 = vmul.u32 %v1412_v60, %v128_v33 }
  0xd0   :  { %v1432_v41 = vmul.u32.u64.low %v1412_v60, %v136_v38  ;;  %v1433_v45 = vmul.u32.u64.high %v1412_v60, %v136_v38, %v1432_v41  ;;  %v1436_v46 = vmul.u32.u64.low %v1412_v60, %v132_v37  ;;  %v1437_v47 = vmul.u32.u64.high %v1412_v60, %v132_v37, %v1436_v46 }
  0xd1   :  { %v223_v49 = vor.u32 %v222_v36, %v221_v40  ;;  %vm227_vm6 = vcmp.lt.s32.totalorder %v1414_v61, 4  ;;  %v209_v51 = vshll.u32 %v1295_v0, %v206_v4  ;;  %v210_v52 = vshrl.u32 %v1296_v2, %v207_v21 }
  0xd2   :  { %v213_v53 = vshrl.u32 %v1297_v5, %v207_v21  ;;  %v212_v56 = vshll.u32 %v1296_v2, %v206_v4  ;;  %v215_v57 = vshll.u32 %v1297_v5, %v206_v4  ;;  %v216_v58 = vshrl.u32 %v1298_v7, %v207_v21 }
  0xd3   :  { %v237_v54 = vsel %vm227_vm6, %v223_v49, 1326507024  ;;  %vm146_vm7 = vc.u32 %v1433_v45, %v1436_v46  ;;  %v147_v59 = vadd.s32 1, %v1437_v47  ;;  %v233_v60 = vsel %vm227_vm6, %v220_v39, 920167782 }
  0xd4   :  { %v211_v62 = vor.u32 %v210_v52, %v209_v51  ;;  %v208_v63 = vshrl.u32 %v1295_v0, %v207_v21  ;;  %v214_v1 = vor.u32 %v213_v53, %v212_v56  ;;  %v217_v3 = vor.u32 %v216_v58, %v215_v57 }
  0xd5   :  { %vm226_vm8 = vcmp.lt.s32.totalorder %v1414_v61, 3  ;;  %v148_v6 = vsel %vm146_vm7, %v147_v59, %v1437_v47  ;;  %vm224_vm9 = vcmp.lt.s32.totalorder %v1414_v61, 1  ;;  %vm225_vm10 = vcmp.lt.s32.totalorder %v1414_v61, 2 }
  0xd6   :  { %v238_v2 = vsel %vm226_vm8, %v220_v39, %v237_v54  ;;  %v149_v4 = vadd.s32 %v148_v6, %v144_v48  ;;  %v229_v5 = vsel %vm227_vm6, %v217_v3, 2102212464  ;;  %v232_v7 = vsel %vm224_vm9, %v211_v62, %v214_v1 }
  0xd7   :  { %v234_v8 = vsel %vm226_vm8, %v217_v3, %v233_v60  ;;  %v236_v9 = vsel %vm224_vm9, %v214_v1, %v217_v3  ;;  %v240_v10 = vshll.u32 %v200_v50, 8  ;;  %v228_v12 = vsel %vm224_vm9, %v208_v63, %v211_v62 }
  0xd8   :  { %v235_v0 = vsel %vm225_vm10, %v232_v7, %v234_v8  ;;  %v150_v11 = vadd.s32 536870912, %v149_v4  ;;  %v230_v13 = vsel %vm226_vm8, %v214_v1, %v229_v5  ;;  %v239_v14 = vsel %vm225_vm10, %v236_v9, %v238_v2 }
  0xd9   :  { %v1460_v15 = vmul.u32.u64.low %v240_v10, %v239_v14  ;;  %v1461_v16 = vmul.u32.u64.high %v240_v10, %v239_v14, %v1460_v15  ;;  %v1463_v17 = vmul.u32.u64.low %v240_v10, %v235_v0  ;;  %v1464_v18 = vmul.u32.u64.high %v240_v10, %v235_v0, %v1463_v17 }
  0xda   :  { %v151_v19 = vshrl.u32 %v150_v11, 30  ;;  %v231_v20 = vsel %vm225_vm10, %v228_v12, %v230_v13  ;;  %v145_v35 = vadd.s32 %v1436_v46, %v1433_v45  ;;  %vm181_vm9 = vweird.f32 %v1402_v42 }
  0xdb   :  { %vm249_vm11 = vc.u32 %v1461_v16, %v1463_v17  ;;  %v250_v22 = vadd.s32 1, %v1464_v18  ;;  %v247_v24 = vmul.u32 %v240_v10, %v231_v20  ;;  %v248_v58 = vadd.s32 %v1463_v17, %v1461_v16 }
  0xdc   :  { %v152_v21 = vshll.u32 %v151_v19, 30  ;;  %v175_v2 = vsub.s32 4, %v151_v19 }
  0xdd   :  { %v251_v25 = vsel %vm249_vm11, %v250_v22, %v1464_v18 }
  0xde   :  { %v153_v23 = vsub.s32 %v149_v4, %v152_v21  ;;  %v252_v27 = vadd.s32 %v251_v25, %v247_v24  ;;  %v176_v0 = vsel %vm91_vm15, %v175_v2, %v151_v19 }
  0xdf   :  { %v178_v11 = vsel %vm90_vm14, 0, %v176_v0 }
  0xe0   :  { %v155_v26 = vsub.s32 0, %v153_v23  ;;  %v253_v29 = vadd.s32 536870912, %v252_v27  ;;  %v390_v14 = vadd.s32 3, %v178_v11  ;;  %v182_v19 = vand.u32 3, %v178_v11 }
  0xe2   :  { %v988_v28 = vmin.u32 %v155_v26, %v153_v23  ;;  %v254_v31 = vshrl.u32 %v253_v29, 30  ;;  %v391_v20 = vand.u32 3, %v390_v14  ;;  %vm184_vm2 = vcmp.eq.s32.totalorder %v182_v19, 0  ;;  %v1037_v14 = vld [vmem:[%s1507_s6] ss:$0 sm:$0xff] }
  0xe3   :  { %vm187_vm5 = vcmp.eq.s32.totalorder %v182_v19, 2  ;;  %vm183_vm7 = vcmp.lt.s32.totalorder %v182_v19, 2 }
  0xe4   :  { %v157_v30 = vclz %v988_v28  ;;  %v255_v33 = vshll.u32 %v254_v31, 30  ;;  %v278_v10 = vsub.s32 4, %v254_v31  ;;  %vm393_vm3 = vcmp.eq.s32.totalorder %v391_v20, 0 }
  0xe5   :  { %vm396_vm4 = vcmp.eq.s32.totalorder %v391_v20, 2  ;;  %vm392_vm6 = vcmp.lt.s32.totalorder %v391_v20, 2 }
  0xe6   :  { %v989_v32 = vadd.s32 4294967294, %v157_v30  ;;  %v256_v61 = vsub.s32 %v252_v27, %v255_v33  ;;  %v279_v13 = vsel %vm194_vm0, %v278_v10, %v254_v31 }
  0xe7   :  { %v281_v18 = vsel %vm193_vm1, 0, %v279_v13 }
  0xe8   :  { %vm990_vm12 = vcmp.lt.s32.totalorder %v989_v32, 0  ;;  %v258_v38 = vsub.s32 0, %v256_v61  ;;  %v285_v24 = vand.u32 3, %v281_v18 }
  0xe9   :  { %v160_v34 = vsel %vm990_vm12, 0, %v989_v32 }
  0xea   :  { %v161_v36 = vsub.s32 32, %v160_v34  ;;  %v165_v37 = vsub.s32 4294967266, %v160_v34  ;;  %v162_v39 = vshll.u32 %v153_v23, %v160_v34  ;;  %v992_v47 = vmin.u32 %v258_v38, %v256_v61 }
  0xeb   :  { %v494_v23 = vadd.s32 3, %v281_v18  ;;  %vm287_vm8 = vcmp.eq.s32.totalorder %v285_v24, 0  ;;  %vm290_vm12 = vcmp.eq.s32.totalorder %v285_v24, 2 }
  0xec   :  { %v163_v40 = vshrl.u32 %v145_v35, %v161_v36  ;;  %v166_v41 = vadd.s32 127, %v165_v37  ;;  %v260_v50 = vclz %v992_v47 }
  0xed   :  { %v495_v28 = vand.u32 3, %v494_v23 }
  0xee   :  { %v164_v48 = vor.u32 %v163_v40, %v162_v39  ;;  %v167_v49 = vshll.u32 %v166_v41, 23  ;;  %v993_v52 = vadd.s32 4294967294, %v260_v50 }
  0xef   :  { %vm497_vm10 = vcmp.eq.s32.totalorder %v495_v28, 0  ;;  %vm500_vm11 = vcmp.eq.s32.totalorder %v495_v28, 2 }
  0xf0   :  { %v168_v51 = vor.u32 4788187, %v167_v49  ;;  %v171_v54 = vcvt.s32.f32 %v164_v48  ;;  %vm994_vm13 = vcmp.lt.s32.totalorder %v993_v52, 0 }
  0xf1   :  { %v263_v56 = vsel %vm994_vm13, 0, %v993_v52  ;;  %vm496_vm13 = vcmp.lt.s32.totalorder %v495_v28, 2  ;;  %v1175_v52 = vld [vmem:[#allocation7] sm:$0xff]  }
  0xf2   :  { %v169_v53 = vand.u32 2147483647, %v168_v51  ;;  %v264_v45 = vsub.s32 32, %v263_v56  ;;  %v268_v46 = vsub.s32 4294967266, %v263_v56  ;;  %v265_v60 = vshll.u32 %v256_v61, %v263_v56  ;;  %v1178_v56 = vld [vmem:[#allocation7 + $0x18] sm:$0xff]  }
  0xf4   :  { %v172_v57 = vmul.f32 %v171_v54, %v169_v53  ;;  %v266_v62 = vshrl.u32 %v248_v58, %v264_v45  ;;  %v269_v63 = vadd.s32 127, %v268_v46  ;;  %v1301_v53 = vmov 0.0   ;;  %v1176_v54 = vld [vmem:[#allocation7 + $0x8] sm:$0xff]   ;;  %v1181_v45 = vld [vmem:[#allocation7 + $0x30] sm:$0xff]   ;;  %v1182_v46 = vld [vmem:[#allocation7 + $0x38] sm:$0xff]  }
  0xf5   :  { %1099 = vmatprep.subr.bf16.mxu0 %v1301_v53  ;;  %v1180_v58 = vld [vmem:[#allocation7 + $0x28] sm:$0xff]  }
  0xf6   :  { %v173_v59 = vxor.u32 2147483648, %v172_v57  ;;  %v267_v3 = vor.u32 %v266_v62, %v265_v60  ;;  %v270_v6 = vshll.u32 %v269_v63, 23 }
  0xf8   :  { %v174_v1 = vsel %vm91_vm15, %v173_v59, %v172_v57  ;;  %v271_v5 = vor.u32 4788187, %v270_v6  ;;  %v274_v8 = vcvt.s32.f32 %v267_v3  ;;  %vm284_vm15 = vweird.f32 %v1404_v43  ;;  %v1179_v57 = vld [vmem:[#allocation7 + $0x20] sm:$0xff]  }
  0xf9   :  { %v177_v4 = vsel %vm90_vm14, %v1402_v42, %v174_v1  ;;  %vm286_vm14 = vcmp.lt.s32.totalorder %v285_v24, 2 }
  0xfa   :  { %1183 = vcosq.f32 %v177_v4  ;;  %v272_v7 = vand.u32 2147483647, %v271_v5 }
  0xfb   :  { %1185 = vsinq.f32 %v177_v4  ;;  %v1035_v4 = vld [vmem:[%s1505_s4] ss:$0 sm:$0xff]  ;;  %s1261_s4 = scalar_lea.vmem %s978_s20, 128 }
  0xfc   :  { %v275_v9 = vmul.f32 %v274_v8, %v272_v7  ;;  %p1262_p10 = scmp.ne.s32.totalorder %s978_s20, %s1261_s4  ;;  %p1267_p12 = scmp.lt.s32.totalorder %s1261_s4, %s1261_s4 }
  0xfe   :  { %v276_v12 = vxor.u32 2147483648, %v275_v9  ;;  %p1268_p13 = por %p1267_p12, %p1266_p11 }
 0x100   :  { %v277_v44 = vsel %vm194_vm0, %v276_v12, %v275_v9  ;;  %vm1302_vm0 = vmmov 0   ;;  %p1269_p0 = pnand %p1268_p13, %p1262_p10 }
 0x101   :  { %v280_v15 = vsel %vm193_vm1, %v1404_v43, %v277_v44  ;;  %v1177_v43 = vld [vmem:[#allocation7 + $0x10] sm:$0xff]  }
 0x102   :  { %1187 = vcosq.f32 %v280_v15 }
 0x103   :  { %1189 = vsinq.f32 %v280_v15 }
 0x104   :  { %v1184_v16 = vpop.eup %1183 }
 0x105   :  { %v1186_v17 = vpop.eup %1185  ;;  %v188_v22 = vxor.u32 2147483648, %v1184_v16 }
 0x106   :  { %v185_v21 = vxor.u32 2147483648, %v1186_v17 }
 0x107   :  { %v398_v25 = vsel %vm396_vm4, %v188_v22, %v1186_v17  ;;  %v189_v27 = vsel %vm187_vm5, %v188_v22, %v1186_v17 }
 0x108   :  { %v395_v55 = vsel %vm393_vm3, %v1184_v16, %v185_v21  ;;  %v186_v26 = vsel %vm184_vm2, %v1184_v16, %v185_v21 }
 0x109   :  { %v399_v30 = vsel %vm392_vm6, %v395_v55, %v398_v25  ;;  %v190_v31 = vsel %vm183_vm7, %v186_v26, %v189_v27 }
 0x10a   :  { %v400_v36 = vsel %vm181_vm9, nan, %v399_v30  ;;  %v191_v37 = vsel %vm181_vm9, nan, %v190_v31 }
 0x10b   :  { %v505_v49 = vpack.c.bf16 %v400_v36, %v400_v36  ;;  %v295_v42 = vpack.c.bf16 %v191_v37, %v191_v37 }
 0x10c   :  { %v1188_v29 = vpop.eup %1187 }
 0x10d   :  { %v1190_v32 = vpop.eup %1189  ;;  %v291_v33 = vxor.u32 2147483648, %v1188_v29 }
 0x10e   :  { %v288_v61 = vxor.u32 2147483648, %v1190_v32 }
 0x10f   :  { %v502_v34 = vsel %vm500_vm11, %v291_v33, %v1190_v32  ;;  %v292_v35 = vsel %vm290_vm12, %v291_v33, %v1190_v32 }
 0x110   :  { %v499_v38 = vsel %vm497_vm10, %v1188_v29, %v288_v61  ;;  %v289_v39 = vsel %vm287_vm8, %v1188_v29, %v288_v61 }
 0x111   :  { %v503_v40 = vsel %vm496_vm13, %v499_v38, %v502_v34  ;;  %v293_v41 = vsel %vm286_vm14, %v289_v39, %v292_v35 }
 0x112   :  { %v504_v47 = vsel %vm284_vm15, nan, %v503_v40  ;;  %v294_v48 = vsel %vm284_vm15, nan, %v293_v41 }
 0x113   :  { %v506_v50 = vpack.c.bf16 %v504_v47, %v504_v47  ;;  %v296_v51 = vpack.c.bf16 %v294_v48, %v294_v48 }
 0x115   :  { %699 = vmatprep.mubr.bf16.mxu0 %v506_v50  ;;  %835 = vmatprep.mubr.bf16.mxu1 %v296_v51 }
 0x116   :  { %700 = vmatmul.mubr.bf16.vlgmr.msra.gmra.mrb[0].mxu0 %v505_v49  ;;  %836 = vmatmul.mubr.bf16.vlgmr.msra.gmra.mrb[0].mxu1 %v295_v42 }
 0x117   :  { %1100 = vmatpush3.bf16.msra.mxu0 %v1175_v52  ;;  %1115 = vmatprep.mubr.msk.bf16.mxu0 %vm1302_vm0, %v1301_v53 }
 0x118   :  { %1101 = vmatprep.subr.bf16.mxu0 %v1301_v53 }
 0x11b   :  { %1102 = vmatpush3.bf16.msra.mxu0 %v1176_v54 }
 0x11c   :  { %1103 = vmatprep.subr.bf16.mxu0 %v1301_v53 }
 0x11f   :  { %1104 = vmatpush3.bf16.msra.mxu0 %v1177_v43 }
 0x120   :  { %1105 = vmatprep.subr.bf16.mxu0 %v1301_v53 }
 0x123   :  { %1106 = vmatpush3.bf16.msra.mxu0 %v1178_v56 }
 0x124   :  { %1107 = vmatprep.subr.bf16.mxu0 %v1301_v53 }
 0x127   :  { %1108 = vmatpush3.bf16.msra.mxu0 %v1179_v57 }
 0x128   :  { %1109 = vmatprep.subr.bf16.mxu0 %v1301_v53 }
 0x12b   :  { %1110 = vmatpush3.bf16.msra.mxu0 %v1180_v58 }
 0x12c   :  { %1111 = vmatprep.subr.bf16.mxu0 %v1301_v53 }
 0x12f   :  { %1112 = vmatpush3.bf16.msra.mxu0 %v1181_v45 }
 0x130   :  { %1113 = vmatprep.subr.bf16.mxu0 %v1301_v53 }
 0x133   :  { %1114 = vmatpush3.bf16.msra.mxu0 %v1182_v46 }
 0x1e9   :  { %v1062_v59 = vpop.f32.mrb[0].mxu0  ;;  %v1084_v60 = vpop.f32.mrb[0].mxu1 }
 0x1ea   :  { %v1063_v62 = vpop.f32.mrb[1].mxu0  ;;  %v1085_v63 = vpop.f32.mrb[1].mxu1 }
 0x1eb   :  { %v1064_v1 = vadd.f32 %v1063_v62, %v1062_v59  ;;  %v1086_v3 = vadd.f32 %v1085_v63, %v1084_v60  ;;  %v1065_v6 = vpop.f32.mrb[2].mxu0  ;;  %v1087_v2 = vpop.f32.mrb[2].mxu1 }
 0x1ec   :  { %v1066_v5 = vpop.f32.mrb[3].mxu0  ;;  %v1088_v7 = vpop.f32.mrb[3].mxu1 }
 0x1ed   :  { %v838_v8 = vadd.f32 %v1086_v3, %v1064_v1 }
 0x1ef   :  { %v850_v0 = vadd.f32 %v1035_v4, %v838_v8 }
 0x1f1   :  { %v1036_v9 = vmul.f32 -1.442695, %v850_v0 }
 0x1f3   :  { %1191 = vpow2.f32 %v1036_v9 }
 0x1fd   :  { %v1192_v10 = vpop.eup %1191 }
 0x1fe   :  { %v854_v11 = vadd.f32 1.0, %v1192_v10 }
 0x200   :  { %1193 = vrcp.f32 %v854_v11 }
 0x20a   :  { %v1194_v12 = vpop.eup %1193 }
 0x20b   :  { %v857_v44 = vmul.f32 %v1194_v12, %v850_v0 }
 0x20d   :  { %v858_v13 = vpack.c.bf16 %v857_v44, %v857_v44 }
 0x20f   :  { %1116 = vmatmul.mubr.bf16.vlgmr.msra.gmra.mrb[4].mxu0 %v858_v13 }
 0x2e2   :  { %v964_v15 = vpop.f32.mrb[4].mxu0 }
 0x2e3   :  { %v965_v16 = vadd.f32 %v1037_v14, %v964_v15  ;;  %v1117_v17 = vpop.f32.mrb[5].mxu0 }
 0x2e4   :  { %v967_v18 = vpop.f32.mrb[6].mxu0 }
 0x2e5   :  { %970 = vst [vmem:[#allocation8] sm:$0xff] %v965_v16  ;;  %v1118_v19 = vpop.f32.mrb[7].mxu0 }
 0x2e6   :  { %1272 = shalt.err (!%p1269_p0)
}
 0x2e7   :  { %s1273_s6 = scalar_lea.hbm %s1508_s7, 128 }
 0x2e8   :  { %p1274_p1 = scmp.ne.s32.totalorder %s1508_s7, %s1273_s6  ;;  %p1277_p2 = scmp.lt.u32.totalorder %s1273_s6, %s1508_s7 }
 0x2ea   :  { %p1279_p3 = pnand %p1277_p2, %p1274_p1 }
 0x2ec   :  { %1282 = shalt.err (!%p1279_p3)
}
 0x2ed   :  { %980 = dma.vmem_to_hbm [thread:$0]  %s978_s20, 128, %s1508_s7, [#allocation4]  }
 0x2ee   :  { %1287 = dma.done.wait [#allocation4], 128  }
 0x2ef   :  { %1288 = vsyncadd [#allocation4], 4294967168 }
 0x2f0   :  { %984 = vsyncpa [#allocation3], 1 }
 0x2f1   :  { %985 = vsyncpa [#allocation6], 1 }
 0x2f2   :  { %986 = vsyncpa [#allocation4], 1 }

</bundles_post_ra>
